<compile_context>
chip_gen: v6e
topology: v6e:2x2x1
jax: 0.10.0
libtpu: 0.0.40
codegen_flags: <defaults>
</compile_context>

<pallas_src>
import functools

import jax
import jax.numpy as jnp
from jax.experimental import pallas as pl
from jax.experimental.pallas import tpu as pltpu

_MAX_TILE_M = 256  # multiple of 16; keeps double-buffered x/out tiles well under scoped VMEM


def _linear_relu_kernel(x_ref, w_ref, b_ref, o_ref):
    """One grid step: out = relu(x @ w_t + b); f32 accumulate + f32 epilogue."""
    x = x_ref[...].astype(w_ref.dtype)  # cheap VPU cast in VMEM (bf16 path); no-op for f32
    acc = jnp.dot(x, w_ref[...], preferred_element_type=jnp.float32)
    o_ref[...] = jnp.maximum(acc + b_ref[...], 0.0).astype(o_ref.dtype)


def prepare_params(w, b, *, use_bf16=True):
    """One-time parameter prep (call OUTSIDE the per-step jit).

    w: (N, K) PyTorch-style nn.Linear weight -> returns w_t (K, N), optionally bf16.
    b: (N,) bias -> returns (1, N) f32 (kept f32: bias-add/ReLU run on the f32 VPU path).
    """
    w_t = jnp.asarray(w).T
    if use_bf16:
        w_t = w_t.astype(jnp.bfloat16)
    b2d = jnp.asarray(b).reshape(1, -1).astype(jnp.float32)
    return w_t, b2d


def _round_up(v, m):
    return ((v + m - 1) // m) * m


@jax.jit
def img_nn_forward(x, w_t, b2d):
    """Pallas ImgNN forward: relu(x @ w_t + b).

    x:   (M, K) float32 activations
    w_t: (K, N) float32 or bfloat16 (pre-cast via prepare_params)
    b2d: (1, N) float32
    """
    M, K = x.shape
    K2, N = w_t.shape
    assert K == K2 and b2d.shape == (1, N)

    # Sublane-friendly batch padding: 16 rows for the bf16 MXU path, 8 for f32.
    sub = 16 if w_t.dtype == jnp.bfloat16 else 8
    if M <= _MAX_TILE_M:
        tile_m = max(_round_up(M, sub), sub)   # single grid step (fast path at small M)
    else:
        tile_m = _MAX_TILE_M
    mp = _round_up(M, tile_m)
    # NOTE: at very large M the wrapper-side pad below should be replaced by an
    # in-kernel ragged-tail mask; negligible at the tile sizes used here.
    x_p = x if mp == M else jnp.pad(x, ((0, mp - M), (0, 0)))

    grid = (mp // tile_m,)
    cost = pl.CostEstimate(
        flops=2 * mp * K * N,
        transcendentals=0,
        bytes_accessed=(mp * K * x.dtype.itemsize
                        + K * N * w_t.dtype.itemsize
                        + N * 4
                        + mp * N * 4),
    )

    out = pl.pallas_call(
        _linear_relu_kernel,
        out_shape=jax.ShapeDtypeStruct((mp, N), jnp.float32),
        grid=grid,
        in_specs=[
            pl.BlockSpec((tile_m, K), lambda i: (i, 0)),   # x tile marches over M
            pl.BlockSpec((K, N), lambda i: (0, 0)),        # weight stays VMEM-resident
            pl.BlockSpec((1, N), lambda i: (0, 0)),        # bias stays VMEM-resident
        ],
        out_specs=pl.BlockSpec((tile_m, N), lambda i: (i, 0)),
        compiler_params=pltpu.CompilerParams(dimension_semantics=("parallel",)),
        cost_estimate=cost,
    )(x_p, w_t, b2d)

    return out[:M] if mp != M else out


def _reference_f32(x, w, b):
    return jnp.maximum(x @ w.T + b, 0.0)


if __name__ == "__main__":
    # Small shapes consistent with the module (nn.Linear: input_dim -> output_dim).
    batch, input_dim, output_dim = 8, 512, 256

    key = jax.random.PRNGKey(0)
    kx, kw, kb = jax.random.split(key, 3)

    x = jax.random.normal(kx, (batch, input_dim), dtype=jnp.float32)

    # Deterministic init mimicking nn.Linear's uniform(-1/sqrt(in), 1/sqrt(in)).
    bound = 1.0 / jnp.sqrt(jnp.float32(input_dim))
    w = jax.random.uniform(
        kw, (output_dim, input_dim), minval=-bound, maxval=bound, dtype=jnp.float32
    )
    b = jax.random.uniform(
        kb, (output_dim,), minval=-bound, maxval=bound, dtype=jnp.float32
    )

    # Parameters are prepared ONCE (transpose + bf16 cast hoisted out of the per-call jit).
    w_t, b2d = prepare_params(w, b, use_bf16=True)

    out = img_nn_forward(x, w_t, b2d)
    jax.block_until_ready(out)
    assert out.shape == (batch, output_dim)

    # Exact-path check: same bf16 rounding of x and w + f32 accumulation as the kernel.
    xq = x.astype(jnp.bfloat16).astype(jnp.float32)
    wq = w.T.astype(jnp.bfloat16).astype(jnp.float32)
    ref_q = jnp.maximum(
        jnp.dot(xq, wq, precision=jax.lax.Precision.HIGHEST) + b, 0.0
    )
    assert jnp.allclose(out, ref_q, atol=1e-4, rtol=1e-4)

    # Semantic check vs. the full-f32 PyTorch forward (bf16 MXU inputs => looser tol).
    assert jnp.allclose(out, _reference_f32(x, w, b), atol=5e-2, rtol=5e-2)

    # Ragged-batch path (padding to 16 + slice-off) with strict-f32 weights.
    w_t32, b2d32 = prepare_params(w, b, use_bf16=False)
    x2 = jax.random.normal(jax.random.PRNGKey(1), (5, input_dim), dtype=jnp.float32)
    out2 = img_nn_forward(x2, w_t32, b2d32)
    jax.block_until_ready(out2)
    assert out2.shape == (5, output_dim)
    assert jnp.allclose(out2, _reference_f32(x2, w, b), atol=1e-4, rtol=1e-4)

    print("KERNEL_OK")
</pallas_src>

<mosaic_0001>
module attributes {stable_mosaic.version = 11 : i64} {
  func.func @_linear_relu_kernel(%arg0: i32, %arg1: memref<16x512xf32, #tpu.memory_space<vmem>>, %arg2: memref<512x256xbf16, #tpu.memory_space<vmem>>, %arg3: memref<1x256xf32, #tpu.memory_space<vmem>>, %arg4: memref<16x256xf32, #tpu.memory_space<vmem>>) attributes {dimension_semantics = [#tpu.dimension_semantics<parallel>], iteration_bounds = array<i64: 1>, scalar_prefetch = 0 : i64, scratch_operands = 0 : i64, tpu.core_type = #tpu.core_type<tc>, window_params = [{transform_indices = @transform_0, window_bounds = array<i64: 16, 512>}, {pipeline_mode = #tpu.pipeline_mode<synchronous>, transform_indices = @transform_1, window_bounds = array<i64: 512, 256>}, {pipeline_mode = #tpu.pipeline_mode<synchronous>, transform_indices = @transform_2, window_bounds = array<i64: 1, 256>}, {transform_indices = @transform_3, window_bounds = array<i64: 16, 256>}]} {
    %c0 = arith.constant 0 : index
    %c0_0 = arith.constant 0 : index
    %0 = vector.load %arg1[%c0, %c0_0] : memref<16x512xf32, #tpu.memory_space<vmem>>, vector<16x512xf32>
    %1 = arith.truncf %0 : vector<16x512xf32> to vector<16x512xbf16>
    %c0_1 = arith.constant 0 : index
    %c0_2 = arith.constant 0 : index
    %2 = vector.load %arg2[%c0_1, %c0_2] : memref<512x256xbf16, #tpu.memory_space<vmem>>, vector<512x256xbf16>
    %cst = arith.constant dense<0.000000e+00> : vector<16x256xf32>
    %3 = tpu.matmul %1, %2, %cst {dimension_numbers = #tpu.dot_dimension_numbers<[1], [0], [0], [1], [0, 0, 1, 1], [], []>} : vector<16x512xbf16>, vector<512x256xbf16>, vector<16x256xf32> -> vector<16x256xf32>
    %c0_3 = arith.constant 0 : index
    %c0_4 = arith.constant 0 : index
    %4 = vector.load %arg3[%c0_3, %c0_4] : memref<1x256xf32, #tpu.memory_space<vmem>>, vector<1x256xf32>
    %5 = vector.broadcast %4 : vector<1x256xf32> to vector<16x256xf32>
    %6 = arith.addf %3, %5 : vector<16x256xf32>
    %cst_5 = arith.constant 0.000000e+00 : f32
    %7 = vector.broadcast %cst_5 : f32 to vector<16x256xf32>
    %8 = arith.maximumf %6, %7 : vector<16x256xf32>
    %c0_6 = arith.constant 0 : index
    %c0_7 = arith.constant 0 : index
    %9 = vector.load %arg4[%c0_6, %c0_7] : memref<16x256xf32, #tpu.memory_space<vmem>>, vector<16x256xf32>
    tpu.vector_store %arg4[%c0_6, %c0_7], %8 {strides = array<i32>} : memref<16x256xf32, #tpu.memory_space<vmem>>, vector<16x256xf32>,
    return
  }
  func.func @transform_0(%arg0: i32) -> (i32, i32) {
    %c0_i32 = arith.constant 0 : i32
    %c0_i32_0 = arith.constant 0 : i32
    return %arg0, %c0_i32 : i32, i32
  }
  func.func @transform_1(%arg0: i32) -> (i32, i32) {
    %c0_i32 = arith.constant 0 : i32
    %c0_i32_0 = arith.constant 0 : i32
    %c0_i32_1 = arith.constant 0 : i32
    return %c0_i32, %c0_i32_0 : i32, i32
  }
  func.func @transform_2(%arg0: i32) -> (i32, i32) {
    %c0_i32 = arith.constant 0 : i32
    %c0_i32_0 = arith.constant 0 : i32
    %c0_i32_1 = arith.constant 0 : i32
    return %c0_i32, %c0_i32_0 : i32, i32
  }
  func.func @transform_3(%arg0: i32) -> (i32, i32) {
    %c0_i32 = arith.constant 0 : i32
    %c0_i32_0 = arith.constant 0 : i32
    return %arg0, %c0_i32 : i32, i32
  }
}

</mosaic_0001>

<bundles_post_ra>
// kernel: img_nn_forward.1
= control target key start
LH: loop header
LB: loop body
LE: loop exit
PB: predicated region body
PF: predicated region fallthrough
CT: control target
= control target key end

     0   :  { %8 = vsyncpa [#allocation3], 0  ;;  %s720_s12 = smov [#allocation2]   ;;  %s785_s0 = inlined_call_operand.vmem [shape: f32[16,512], index: 0, kind: input, shape index: {}]   ;;  %s786_s1 = inlined_call_operand.hbm [shape: bf16[512,256], index: 1, kind: input, shape index: {}]   ;;  %s787_s2 = inlined_call_operand.vmem [shape: f32[1,256], index: 2, kind: input, shape index: {}]   ;;  %s788_s3 = inlined_call_operand.vmem [shape: f32[16,256], index: 3, kind: output, shape index: {}]  }
   0x1   :  { %s16_s13 = sshll.u32 %s720_s12, 4  ;;  %s17_s13 = int_to_ptr.vmem [resolvable:$true] %s16_s13 }
   0x2   :  { %s706_s14 = scalar_lea.vmem %s17_s13, 8192  ;;  %p711_p1 = scmp.lt.s32.totalorder %s17_s13, %s17_s13 }
   0x3   :  { %p707_p0 = scmp.ne.s32.totalorder %s17_s13, %s706_s14  ;;  %p712_p2 = scmp.lt.s32.totalorder %s706_s14, %s706_s14 }
   0x5   :  { %p713_p3 = por %p712_p2, %p711_p1 }
   0x7   :  { %p714_p4 = pnand %p713_p3, %p707_p0 }
   0x9   :  { %717 = shalt.err (!%p714_p4)
}
   0xa   :  { %s721_s15 = smov 128   ;;  %s722_s16 = smov 8  }
   0xb   :  { %22 = dma.hbm_to_vmem [thread:$0]  %s786_s1, 8192, %s17_s13, [#allocation3], %s721_s15, %s721_s15, %s722_s16  }
   0xc   :  { %718 = dma.done.wait [#allocation3], 8192  }
   0xd   :  { %719 = vsyncadd [#allocation3], 4294959104  ;;  %v602_v0 = vld [vmem:[#allocation2 + $0x74] ss:$8 sps:$4 sm:$0xff]   ;;  %v606_v2 = vld [vmem:[#allocation2 + $0x70] ss:$8 sps:$4 sm:$0xff]  }
   0xe   :  { %v604_v1 = vld [vmem:[#allocation2 + $0x174] ss:$8 sps:$4 sm:$0xff]   ;;  %436 = vmatprep.subr.bf16.mxu0 %v602_v0  ;;  %v607_v3 = vld [vmem:[#allocation2 + $0x170] ss:$8 sps:$4 sm:$0xff]   ;;  %v608_v4 = vld [vmem:[#allocation2 + $0x64] ss:$8 sps:$4 sm:$0xff]  }
   0xf   :  { %479 = vmatprep.subr.bf16.mxu1 %v604_v1  ;;  %437 = vmatpush1.bf16.msra.mxu0 %v606_v2  ;;  %v610_v5 = vld [vmem:[#allocation2 + $0x164] ss:$8 sps:$4 sm:$0xff]   ;;  %v612_v6 = vld [vmem:[#allocation2 + $0x60] ss:$8 sps:$4 sm:$0xff]   ;;  %v614_v8 = vld [vmem:[#allocation2 + $0x54] ss:$8 sps:$4 sm:$0xff]  }
  0x10   :  { %480 = vmatpush1.bf16.msra.mxu1 %v607_v3  ;;  %438 = vmatprep.subr.bf16.mxu0 %v608_v4  ;;  %v613_v7 = vld [vmem:[#allocation2 + $0x160] ss:$8 sps:$4 sm:$0xff]   ;;  %v616_v9 = vld [vmem:[#allocation2 + $0x154] ss:$8 sps:$4 sm:$0xff]   ;;  %v618_v10 = vld [vmem:[#allocation2 + $0x50] ss:$8 sps:$4 sm:$0xff]  }
  0x11   :  { %481 = vmatprep.subr.bf16.mxu1 %v610_v5  ;;  %v619_v11 = vld [vmem:[#allocation2 + $0x150] ss:$8 sps:$4 sm:$0xff]   ;;  %v620_v12 = vld [vmem:[#allocation2 + $0x44] ss:$8 sps:$4 sm:$0xff]   ;;  %v624_v14 = vld [vmem:[#allocation2 + $0x40] ss:$8 sps:$4 sm:$0xff]  }
  0x12   :  { %v622_v13 = vld [vmem:[#allocation2 + $0x144] ss:$8 sps:$4 sm:$0xff]   ;;  %v625_v15 = vld [vmem:[#allocation2 + $0x140] ss:$8 sps:$4 sm:$0xff]   ;;  %v626_v16 = vld [vmem:[#allocation2 + $0x34] ss:$8 sps:$4 sm:$0xff]  }
  0x13   :  { %439 = vmatpush1.bf16.msra.mxu0 %v612_v6  ;;  %v628_v17 = vld [vmem:[#allocation2 + $0x134] ss:$8 sps:$4 sm:$0xff]   ;;  %v630_v18 = vld [vmem:[#allocation2 + $0x30] ss:$8 sps:$4 sm:$0xff]   ;;  %v632_v20 = vld [vmem:[#allocation2 + $0x24] ss:$8 sps:$4 sm:$0xff]  }
  0x14   :  { %482 = vmatpush1.bf16.msra.mxu1 %v613_v7  ;;  %440 = vmatprep.subr.bf16.mxu0 %v614_v8  ;;  %v631_v19 = vld [vmem:[#allocation2 + $0x130] ss:$8 sps:$4 sm:$0xff]   ;;  %v634_v21 = vld [vmem:[#allocation2 + $0x124] ss:$8 sps:$4 sm:$0xff]   ;;  %v636_v22 = vld [vmem:[#allocation2 + $0x20] ss:$8 sps:$4 sm:$0xff]  }
  0x15   :  { %483 = vmatprep.subr.bf16.mxu1 %v616_v9  ;;  %v637_v23 = vld [vmem:[#allocation2 + $0x120] ss:$8 sps:$4 sm:$0xff]   ;;  %v638_v24 = vld [vmem:[#allocation2 + $0x14] ss:$8 sps:$4 sm:$0xff]   ;;  %v642_v26 = vld [vmem:[#allocation2 + $0x10] ss:$8 sps:$4 sm:$0xff]  }
  0x16   :  { %v640_v25 = vld [vmem:[#allocation2 + $0x114] ss:$8 sps:$4 sm:$0xff]   ;;  %v643_v27 = vld [vmem:[#allocation2 + $0x110] ss:$8 sps:$4 sm:$0xff]   ;;  %v644_v28 = vld [vmem:[#allocation2 + $0x4] ss:$8 sps:$4 sm:$0xff]  }
  0x17   :  { %441 = vmatpush1.bf16.msra.mxu0 %v618_v10  ;;  %v646_v29 = vld [vmem:[#allocation2 + $0x104] ss:$8 sps:$4 sm:$0xff]   ;;  %v648_v30 = vld [vmem:[#allocation2] ss:$8 sps:$4 sm:$0xff]   ;;  %v650_v32 = vld [vmem:[#allocation2 + $0xf4] ss:$8 sps:$4 sm:$0xff]  }
  0x18   :  { %484 = vmatpush1.bf16.msra.mxu1 %v619_v11  ;;  %442 = vmatprep.subr.bf16.mxu0 %v620_v12  ;;  %v649_v31 = vld [vmem:[#allocation2 + $0x100] ss:$8 sps:$4 sm:$0xff]   ;;  %v652_v33 = vld [vmem:[#allocation2 + $0x1f4] ss:$8 sps:$4 sm:$0xff]   ;;  %v654_v34 = vld [vmem:[#allocation2 + $0xf0] ss:$8 sps:$4 sm:$0xff]   ;;  %v106_v12 = vlaneseq }
  0x19   :  { %485 = vmatprep.subr.bf16.mxu1 %v622_v13  ;;  %v655_v35 = vld [vmem:[#allocation2 + $0x1f0] ss:$8 sps:$4 sm:$0xff]   ;;  %v656_v36 = vld [vmem:[#allocation2 + $0xe4] ss:$8 sps:$4 sm:$0xff]   ;;  %v660_v38 = vld [vmem:[#allocation2 + $0xe0] ss:$8 sps:$4 sm:$0xff]  }
  0x1a   :  { %v658_v37 = vld [vmem:[#allocation2 + $0x1e4] ss:$8 sps:$4 sm:$0xff]   ;;  %v661_v39 = vld [vmem:[#allocation2 + $0x1e0] ss:$8 sps:$4 sm:$0xff]   ;;  %v662_v40 = vld [vmem:[#allocation2 + $0xd4] ss:$8 sps:$4 sm:$0xff]  }
  0x1b   :  { %443 = vmatpush1.bf16.msra.mxu0 %v624_v14  ;;  %v664_v41 = vld [vmem:[#allocation2 + $0x1d4] ss:$8 sps:$4 sm:$0xff]   ;;  %v666_v42 = vld [vmem:[#allocation2 + $0xd0] ss:$8 sps:$4 sm:$0xff]   ;;  %v668_v44 = vld [vmem:[#allocation2 + $0xc4] ss:$8 sps:$4 sm:$0xff]  }
  0x1c   :  { %486 = vmatpush1.bf16.msra.mxu1 %v625_v15  ;;  %444 = vmatprep.subr.bf16.mxu0 %v626_v16  ;;  %v667_v43 = vld [vmem:[#allocation2 + $0x1d0] ss:$8 sps:$4 sm:$0xff]   ;;  %v670_v45 = vld [vmem:[#allocation2 + $0x1c4] ss:$8 sps:$4 sm:$0xff]   ;;  %v672_v50 = vld [vmem:[#allocation2 + $0xc0] ss:$8 sps:$4 sm:$0xff]  }
  0x1d   :  { %487 = vmatprep.subr.bf16.mxu1 %v628_v17  ;;  %v29_v46 = vld [vmem:[%s785_s0 + $0x8] sm:$0xff]  ;;  %v31_v48 = vld [vmem:[%s785_s0 + $0x18] sm:$0xff]  ;;  %v28_v6 = vld [vmem:[%s785_s0] sm:$0xff]  ;;  %v107_v13 = vshrl.u32 %v106_v12, 7 }
  0x1e   :  { %v33_v47 = vld [vmem:[%s785_s0 + $0x28] sm:$0xff]  ;;  %v35_v49 = vld [vmem:[%s785_s0 + $0x38] sm:$0xff]  ;;  %v32_v7 = vld [vmem:[%s785_s0 + $0x20] sm:$0xff] }
  0x1f   :  { %445 = vmatpush1.bf16.msra.mxu0 %v630_v18  ;;  %v673_v51 = vld [vmem:[#allocation2 + $0x1c0] ss:$8 sps:$4 sm:$0xff]   ;;  %v37_v52 = vpack.c.bf16 %v33_v47, %v29_v46  ;;  %v39_v53 = vpack.c.bf16 %v35_v49, %v31_v48  ;;  %v674_v54 = vld [vmem:[#allocation2 + $0xb4] ss:$8 sps:$4 sm:$0xff]   ;;  %v678_v56 = vld [vmem:[#allocation2 + $0xb0] ss:$8 sps:$4 sm:$0xff]   ;;  %v36_v10 = vpack.c.bf16 %v32_v7, %v28_v6 }
  0x20   :  { %488 = vmatpush1.bf16.msra.mxu1 %v631_v19  ;;  %446 = vmatprep.subr.bf16.mxu0 %v632_v20  ;;  %v676_v55 = vld [vmem:[#allocation2 + $0x1b4] ss:$8 sps:$4 sm:$0xff]   ;;  %v679_v57 = vld [vmem:[#allocation2 + $0x1b0] ss:$8 sps:$4 sm:$0xff]   ;;  %v680_v58 = vld [vmem:[#allocation2 + $0xa4] ss:$8 sps:$4 sm:$0xff]  }
  0x21   :  { %489 = vmatprep.subr.bf16.mxu1 %v634_v21  ;;  %468 = vmatprep.mubr.bf16.mxu0 %v37_v52  ;;  %v682_v59 = vld [vmem:[#allocation2 + $0x1a4] ss:$8 sps:$4 sm:$0xff]   ;;  %v684_v60 = vld [vmem:[#allocation2 + $0xa0] ss:$8 sps:$4 sm:$0xff]   ;;  %v686_v62 = vld [vmem:[#allocation2 + $0x94] ss:$8 sps:$4 sm:$0xff]  }
  0x22   :  { %511 = vmatprep.mubr.bf16.mxu1 %v39_v53  ;;  %v685_v61 = vld [vmem:[#allocation2 + $0x1a0] ss:$8 sps:$4 sm:$0xff]   ;;  %v688_v63 = vld [vmem:[#allocation2 + $0x194] ss:$8 sps:$4 sm:$0xff]   ;;  %v690_v0 = vld [vmem:[#allocation2 + $0x90] ss:$8 sps:$4 sm:$0xff]  }
  0x23   :  { %447 = vmatpush1.bf16.msra.mxu0 %v636_v22  ;;  %v691_v1 = vld [vmem:[#allocation2 + $0x190] ss:$8 sps:$4 sm:$0xff]   ;;  %v692_v2 = vld [vmem:[#allocation2 + $0x84] ss:$8 sps:$4 sm:$0xff]   ;;  %v696_v4 = vld [vmem:[#allocation2 + $0x80] ss:$8 sps:$4 sm:$0xff]  }
  0x24   :  { %490 = vmatpush1.bf16.msra.mxu1 %v637_v23  ;;  %448 = vmatprep.subr.bf16.mxu0 %v638_v24  ;;  %v694_v3 = vld [vmem:[#allocation2 + $0x184] ss:$8 sps:$4 sm:$0xff]   ;;  %v697_v5 = vld [vmem:[#allocation2 + $0x180] ss:$8 sps:$4 sm:$0xff]   ;;  %v30_v8 = vld [vmem:[%s785_s0 + $0x10] sm:$0xff]  ;;  %v108_v14 = vsub.s32 0, %v107_v13 }
  0x25   :  { %491 = vmatprep.subr.bf16.mxu1 %v640_v25  ;;  %v34_v9 = vld [vmem:[%s785_s0 + $0x30] sm:$0xff]  ;;  %v104_v15 = vld [vmem:[%s787_s2] sm:$0x3]  ;;  %v112_v16 = vsub.s32 1, %v107_v13 }
  0x26   :  { %v38_v11 = vpack.c.bf16 %v34_v9, %v30_v8  ;;  %v109_v17 = vrot.slane %v104_v15, %v108_v14 }
  0x27   :  { %449 = vmatpush1.bf16.msra.mxu0 %v642_v26  ;;  %v113_v18 = vrot.slane %v104_v15, %v112_v16 }
  0x28   :  { %492 = vmatpush1.bf16.msra.mxu1 %v643_v27  ;;  %450 = vmatprep.subr.bf16.mxu0 %v644_v28 }
  0x29   :  { %493 = vmatprep.subr.bf16.mxu1 %v646_v29 }
  0x2b   :  { %451 = vmatpush1.bf16.msra.mxu0 %v648_v30 }
  0x2c   :  { %494 = vmatpush1.bf16.msra.mxu1 %v649_v31  ;;  %452 = vmatprep.subr.bf16.mxu0 %v650_v32 }
  0x2d   :  { %495 = vmatprep.subr.bf16.mxu1 %v652_v33 }
  0x2f   :  { %453 = vmatpush2.bf16.msra.mxu0 %v654_v34 }
  0x30   :  { %496 = vmatpush2.bf16.msra.mxu1 %v655_v35  ;;  %454 = vmatprep.subr.bf16.mxu0 %v656_v36 }
  0x31   :  { %497 = vmatprep.subr.bf16.mxu1 %v658_v37 }
  0x33   :  { %455 = vmatpush2.bf16.msra.mxu0 %v660_v38 }
  0x34   :  { %498 = vmatpush2.bf16.msra.mxu1 %v661_v39  ;;  %456 = vmatprep.subr.bf16.mxu0 %v662_v40 }
  0x35   :  { %499 = vmatprep.subr.bf16.mxu1 %v664_v41 }
  0x37   :  { %457 = vmatpush2.bf16.msra.mxu0 %v666_v42 }
  0x38   :  { %500 = vmatpush2.bf16.msra.mxu1 %v667_v43  ;;  %458 = vmatprep.subr.bf16.mxu0 %v668_v44 }
  0x39   :  { %501 = vmatprep.subr.bf16.mxu1 %v670_v45 }
  0x3b   :  { %459 = vmatpush2.bf16.msra.mxu0 %v672_v50 }
  0x3c   :  { %502 = vmatpush2.bf16.msra.mxu1 %v673_v51  ;;  %460 = vmatprep.subr.bf16.mxu0 %v674_v54 }
  0x3d   :  { %503 = vmatprep.subr.bf16.mxu1 %v676_v55 }
  0x3f   :  { %461 = vmatpush2.bf16.msra.mxu0 %v678_v56 }
  0x40   :  { %504 = vmatpush2.bf16.msra.mxu1 %v679_v57  ;;  %462 = vmatprep.subr.bf16.mxu0 %v680_v58 }
  0x41   :  { %505 = vmatprep.subr.bf16.mxu1 %v682_v59 }
  0x43   :  { %463 = vmatpush2.bf16.msra.mxu0 %v684_v60 }
  0x44   :  { %506 = vmatpush2.bf16.msra.mxu1 %v685_v61  ;;  %464 = vmatprep.subr.bf16.mxu0 %v686_v62 }
  0x45   :  { %507 = vmatprep.subr.bf16.mxu1 %v688_v63 }
  0x47   :  { %465 = vmatpush2.bf16.msra.mxu0 %v690_v0 }
  0x48   :  { %508 = vmatpush2.bf16.msra.mxu1 %v691_v1  ;;  %466 = vmatprep.subr.bf16.mxu0 %v692_v2 }
  0x49   :  { %509 = vmatprep.subr.bf16.mxu1 %v694_v3 }
  0x4b   :  { %467 = vmatpush2.bf16.msra.mxu0 %v696_v4 }
  0x4c   :  { %510 = vmatpush2.bf16.msra.mxu1 %v697_v5 }
  0x4e   :  { %469 = vmatmul.mubr.bf16.vlgmr.msra.gmra.mxu0 %v36_v10 }
  0x4f   :  { %512 = vmatmul.mubr.bf16.vlgmr.msra.gmra.mxu1 %v38_v11 }
 0x10e   :  { %v470_v19 = vpop.f32.mrf.mxu0 }
 0x10f   :  { %v513_v20 = vpop.f32.mrf.mxu1  ;;  %v471_v21 = vadd.f32 %v470_v19, %v109_v17 }
 0x110   :  { %v472_v22 = vpop.f32.mrf.mxu0 }
 0x111   :  { %v515_v23 = vpop.f32.mrf.mxu1  ;;  %v514_v24 = vadd.f32 %v513_v20, %v471_v21  ;;  %v473_v25 = vadd.f32 %v472_v22, %v113_v18 }
 0x112   :  { %v474_v26 = vpop.f32.mrf.mxu0 }
 0x113   :  { %v517_v27 = vpop.f32.mrf.mxu1  ;;  %v522_v28 = vmax.f32 %v514_v24, 0.0  ;;  %v516_v29 = vadd.f32 %v515_v23, %v473_v25  ;;  %v475_v30 = vadd.f32 %v474_v26, %v109_v17 }
 0x114   :  { %v476_v31 = vpop.f32.mrf.mxu0 }
 0x115   :  { %526 = vst [vmem:[%s788_s3] sm:$0xff] %v522_v28  ;;  %v523_v32 = vmax.f32 %v516_v29, 0.0  ;;  %v518_v33 = vadd.f32 %v517_v27, %v475_v30  ;;  %v477_v34 = vadd.f32 %v476_v31, %v113_v18  ;;  %v519_v35 = vpop.f32.mrf.mxu1 }
 0x117   :  { %527 = vst [vmem:[%s788_s3 + $0x8] sm:$0xff] %v523_v32  ;;  %v524_v36 = vmax.f32 %v518_v33, 0.0  ;;  %v520_v37 = vadd.f32 %v519_v35, %v477_v34 }
 0x119   :  { %528 = vst [vmem:[%s788_s3 + $0x10] sm:$0xff] %v524_v36  ;;  %v525_v38 = vmax.f32 %v520_v37, 0.0 }
 0x11b   :  { %529 = vst [vmem:[%s788_s3 + $0x18] sm:$0xff] %v525_v38 }
 0x11c   :  { %534 = vsyncpa [#allocation3], 1 }

</bundles_post_ra>
